<compile_context>
chip_gen: v6e
topology: v6e:2x2x1
jax: 0.10.0
libtpu: 0.0.40
codegen_flags: <defaults>
</compile_context>

<pallas_src>
import numpy as np
import jax
import jax.numpy as jnp
from jax.experimental import pallas as pl
from jax.experimental.pallas import tpu as pltpu

_LANE = 128


# ----------------------------------------------------------------------------
# Host-side table construction
# ----------------------------------------------------------------------------
def _sinusoid_table_np(seq_len: int, d: int) -> np.ndarray:
    """SinusoidalPositionalEmbedding.get_sinusoid_encoding_table (numpy, f32)."""
    pos = np.arange(seq_len, dtype=np.float64)[:, None]
    j = np.arange(d)[None, :]
    angle = (pos / np.power(10000.0, 2.0 * (j // 2) / d)).astype(np.float32)
    tbl = angle.copy()
    tbl[:, 0::2] = np.sin(tbl[:, 0::2])
    tbl[:, 1::2] = np.cos(tbl[:, 1::2])
    return tbl


def _rope_tables_np(seq_len: int, d: int):
    """Flattened, pre-signed RoPE tables, each shaped (1, S*D) f32.

    out[i] = x[i]*cos[i] + partner[i]*sin_signed[i]
      partner[i]    = x[i+1] if i even else x[i-1]
      sin_signed[i] = -sin[i] if i even else +sin[i]
    """
    tbl = _sinusoid_table_np(seq_len, d)
    cos = np.repeat(tbl[:, 1::2], 2, axis=-1).astype(np.float32)   # (S, D)
    sin = np.repeat(tbl[:, 0::2], 2, axis=-1).astype(np.float32)   # (S, D)
    even = (np.arange(d)[None, :] % 2) == 0
    sin_signed = np.where(even, -sin, sin).astype(np.float32)
    n = seq_len * d
    return cos.reshape(1, n), sin_signed.reshape(1, n)


# ----------------------------------------------------------------------------
# Kernel
# ----------------------------------------------------------------------------
def _rope_kernel(q_ref, cos_ref, sin_ref, o_ref):
    # q_ref / o_ref: (TB, TN) in the caller's dtype; cos/sin: (1, TN) f32.
    x = q_ref[...].astype(jnp.float32)          # cast in-register only
    x_next = jnp.roll(x, -1, axis=-1)           # x_next[:, i] = x[:, i+1]
    x_prev = jnp.roll(x, 1, axis=-1)            # x_prev[:, i] = x[:, i-1]
    # Lane-parity select of the pair partner. Block boundaries land on even
    # flattened indices, so in-block lane parity == global parity and the
    # roll wrap-around lanes (lane 0 / lane TN-1) are never selected.
    lane = jax.lax.broadcasted_iota(jnp.int32, (1, x.shape[-1]), 1)
    partner = jnp.where((lane & 1) == 0, x_next, x_prev)
    o_ref[...] = (x * cos_ref[...] + partner * sin_ref[...]).astype(o_ref.dtype)


# ----------------------------------------------------------------------------
# Tiling / VMEM budgeting
# ----------------------------------------------------------------------------
def _vmem_limit_bytes() -> int:
    """Generation-aware scoped-VMEM limit (~70% of physical VMEM).

    Fallback of 48 MiB fits every generation (v7x has only 64 MiB physical)
    and is well above the 16/32 MiB scoped defaults.
    """
    try:
        cap = int(pltpu.get_tpu_info().vmem_capacity_bytes)
        return max(32 << 20, min(int(cap * 0.7), 112 << 20))
    except Exception:
        return 48 << 20


def _choose_tiles(bh: int, n: int, itemsize: int, budget: int, block_target: int):
    """Pick (tb, tn) for the flattened (bh, n=S*D) view.

    Budgeted pipelined working set:
        2*(in + out) data blocks + 2*2 f32 table blocks
          = 4*tb*tn*itemsize + 4*tn*4  <=  budget
    Column tiles: divide n, even (pair boundary), preferably multiple of 128
    lanes (unmasked vst).  Row tiles: multiple of the sublane-packing factor
    (8 f32 / 16 bf16 / 32 int8) unless the full extent is used.
    """
    row_align = max(8, 32 // itemsize)
    min_rows = min(bh, row_align)

    # ---- column tile (lane axis) ----
    if n * itemsize * min_rows <= block_target:
        tn = n
    else:
        cap_cols = max(_LANE, block_target // (itemsize * min_rows))
        tn = 0
        t = (cap_cols // _LANE) * _LANE
        while t >= _LANE:                       # lane-dense divisors of n
            if n % t == 0:
                tn = t
                break
            t -= _LANE
        if tn == 0:                             # even (pair-aligned) divisors
            t = cap_cols - (cap_cols % 2)
            while t >= 2:
                if n % t == 0:
                    tn = t
                    break
                t -= 2
        if tn == 0:
            tn = n                              # last resort: full extent

    # ---- row tile (sublane axis) ----
    table_bytes = 2 * 2 * tn * 4                # 2 tables, double-buffered, f32
    cap_rows = min(max(1, block_target // (tn * itemsize)),
                   max(1, (budget - table_bytes) // (4 * tn * itemsize)))
    if cap_rows >= bh:
        tb = bh
    else:
        tb = (cap_rows // row_align) * row_align
        while tb >= row_align and bh % tb != 0:
            tb -= row_align
        if tb < row_align:
            tb = (cap_rows // 8) * 8
            while tb >= 8 and bh % tb != 0:
                tb -= 8
            if tb < 8:
                tb = bh   # full extent; the raised vmem_limit absorbs the excess

    # ---- minimum-grid split: keep both v7x TensorCores busy and give the
    # pipeline >= 4 steps of DMA/compute overlap, while blocks stay big enough
    # (>= ~1 MiB) that per-step overhead remains negligible. ----
    min_block = 512 << 10
    while (bh // tb) * (n // tn) < 4 and tb * tn * itemsize >= 2 * min_block:
        if tb % (2 * row_align) == 0 and bh % (tb // 2) == 0:
            tb //= 2
        elif tn % (2 * _LANE) == 0 and n % (tn // 2) == 0:
            tn //= 2
        else:
            break

    return tb, tn


# ----------------------------------------------------------------------------
# Public wrapper
# ----------------------------------------------------------------------------
def rotary_positional_embedding(qw: jnp.ndarray) -> jnp.ndarray:
    """JAX/Pallas equivalent of RotaryPositionalEmbedding(embedding_size=D)(qw)
    for qw shaped [..., seq_len, head_size] (seq_dim=-2)."""
    *lead, seq_len, d = qw.shape
    assert d % 2 == 0, "head_size must be even for RoPE"
    bh = int(np.prod(lead)) if lead else 1
    n = seq_len * d
    itemsize = jnp.dtype(qw.dtype).itemsize

    # Tables fully precomputed (repeat-by-2 + alternating sign) on host.
    cos, sin_signed = (jnp.asarray(t) for t in _rope_tables_np(seq_len, d))

    vmem_limit = _vmem_limit_bytes()
    budget = int(vmem_limit * 0.6)              # headroom for compiler scratch
    block_target = min(8 << 20, max(1 << 20, budget // 5))
    tb, tn = _choose_tiles(bh, n, itemsize, budget, block_target)

    # Lane-dense view: rows = flattened leading dims, cols = seq*head.
    q2 = qw.reshape(bh, n)

    # Columns OUTER, rows INNER: the (0, j) table block index is constant
    # across the inner loop, so the f32 tables are not re-DMA'd every step.
    grid = (n // tn, bh // tb)

    out = pl.pallas_call(
        _rope_kernel,
        out_shape=jax.ShapeDtypeStruct((bh, n), qw.dtype),
        grid=grid,
        in_specs=[
            pl.BlockSpec((tb, tn), lambda j, i: (i, j)),
            pl.BlockSpec((1, tn), lambda j, i: (0, j)),
            pl.BlockSpec((1, tn), lambda j, i: (0, j)),
        ],
        out_specs=pl.BlockSpec((tb, tn), lambda j, i: (i, j)),
        compiler_params=pltpu.CompilerParams(
            dimension_semantics=("parallel", "parallel"),
            vmem_limit_bytes=vmem_limit),
        cost_estimate=pl.CostEstimate(
            flops=4 * bh * n,
            transcendentals=0,
            bytes_accessed=2 * bh * n * itemsize + 2 * n * 4),
    )(q2, cos, sin_signed)

    # NOTE: pass input_output_aliases={0: 0} to pallas_call if the caller can
    # donate qw (in-place RoPE); omitted to keep non-destructive semantics.
    return out.reshape(qw.shape)


# ----------------------------------------------------------------------------
# Self-test
# ----------------------------------------------------------------------------
if __name__ == "__main__":
    key = jax.random.PRNGKey(0)
    B, H, S, D = 2, 4, 8, 32   # [btz, n_heads, seq_len, head_size]
    qw = jax.random.normal(key, (B, H, S, D), dtype=jnp.float32)

    out = jax.block_until_ready(rotary_positional_embedding(qw))

    # Pure-JAX reference mirroring the PyTorch forward exactly.
    tbl = jnp.asarray(_sinusoid_table_np(S, D))
    cos_r = jnp.repeat(tbl[:, 1::2], 2, axis=-1)[None, None, :, :]
    sin_r = jnp.repeat(tbl[:, 0::2], 2, axis=-1)[None, None, :, :]
    qw2 = jnp.stack([-qw[..., 1::2], qw[..., ::2]], axis=-1).reshape(qw.shape)
    ref = qw * cos_r + qw2 * sin_r
    np.testing.assert_allclose(np.asarray(out), np.asarray(ref),
                               rtol=1e-5, atol=1e-5)

    # bf16 I/O path: HBM traffic stays bf16, math is f32 in-register.
    qw_bf16 = qw.astype(jnp.bfloat16)
    out_bf16 = jax.block_until_ready(rotary_positional_embedding(qw_bf16))
    qw2_bf16 = jnp.stack([-qw_bf16[..., 1::2], qw_bf16[..., ::2]],
                         axis=-1).reshape(qw.shape).astype(jnp.float32)
    ref_bf16 = qw_bf16.astype(jnp.float32) * cos_r + qw2_bf16 * sin_r
    np.testing.assert_allclose(np.asarray(out_bf16.astype(jnp.float32)),
                               np.asarray(ref_bf16), rtol=2e-2, atol=2e-2)

    print("KERNEL_OK")
</pallas_src>

<mosaic_0001>
module attributes {stable_mosaic.version = 11 : i64} {
  func.func @_rope_kernel(%arg0: i32, %arg1: i32, %arg2: memref<8x256xf32, #tpu.memory_space<vmem>>, %arg3: memref<1x256xf32, #tpu.memory_space<vmem>>, %arg4: memref<1x256xf32, #tpu.memory_space<vmem>>, %arg5: memref<8x256xf32, #tpu.memory_space<vmem>>) attributes {dimension_semantics = [#tpu.dimension_semantics<parallel>, #tpu.dimension_semantics<parallel>], iteration_bounds = array<i64: 1, 1>, scalar_prefetch = 0 : i64, scratch_operands = 0 : i64, tpu.core_type = #tpu.core_type<tc>, window_params = [{transform_indices = @transform_0, window_bounds = array<i64: 8, 256>}, {transform_indices = @transform_1, window_bounds = array<i64: 1, 256>}, {transform_indices = @transform_2, window_bounds = array<i64: 1, 256>}, {transform_indices = @transform_3, window_bounds = array<i64: 8, 256>}]} {
    %c0 = arith.constant 0 : index
    %c0_0 = arith.constant 0 : index
    %0 = vector.load %arg2[%c0, %c0_0] : memref<8x256xf32, #tpu.memory_space<vmem>>, vector<8x256xf32>
    %1 = vector.extract_strided_slice %0 {offsets = [0, 1], sizes = [8, 255], strides = [1, 1]} : vector<8x256xf32> to vector<8x255xf32>
    %2 = vector.extract_strided_slice %0 {offsets = [0, 0], sizes = [8, 1], strides = [1, 1]} : vector<8x256xf32> to vector<8x1xf32>
    %3 = tpu.concatenate %1, %2 in 1 : vector<8x255xf32>, vector<8x1xf32> -> vector<8x256xf32>
    %4 = vector.extract_strided_slice %0 {offsets = [0, 255], sizes = [8, 1], strides = [1, 1]} : vector<8x256xf32> to vector<8x1xf32>
    %5 = vector.extract_strided_slice %0 {offsets = [0, 0], sizes = [8, 255], strides = [1, 1]} : vector<8x256xf32> to vector<8x255xf32>
    %6 = tpu.concatenate %4, %5 in 1 : vector<8x1xf32>, vector<8x255xf32> -> vector<8x256xf32>
    %7 = tpu.iota {dimensions = array<i32: 1>} : vector<1x256xi32>
    %c1_i32 = arith.constant 1 : i32
    %8 = vector.broadcast %c1_i32 : i32 to vector<1x256xi32>
    %9 = arith.andi %7, %8 : vector<1x256xi32>
    %c0_i32 = arith.constant 0 : i32
    %10 = vector.broadcast %c0_i32 : i32 to vector<1x256xi32>
    %11 = arith.cmpi eq, %9, %10 : vector<1x256xi32>
    %12 = vector.shape_cast %11 : vector<1x256xi1> to vector<1x256xi1>
    %13 = vector.broadcast %12 : vector<1x256xi1> to vector<8x256xi1>
    %14 = arith.select %13, %3, %6 : vector<8x256xi1>, vector<8x256xf32>
    %c0_1 = arith.constant 0 : index
    %c0_2 = arith.constant 0 : index
    %15 = vector.load %arg3[%c0_1, %c0_2] : memref<1x256xf32, #tpu.memory_space<vmem>>, vector<1x256xf32>
    %16 = vector.broadcast %15 : vector<1x256xf32> to vector<8x256xf32>
    %17 = arith.mulf %0, %16 : vector<8x256xf32>
    %c0_3 = arith.constant 0 : index
    %c0_4 = arith.constant 0 : index
    %18 = vector.load %arg4[%c0_3, %c0_4] : memref<1x256xf32, #tpu.memory_space<vmem>>, vector<1x256xf32>
    %19 = vector.broadcast %18 : vector<1x256xf32> to vector<8x256xf32>
    %20 = arith.mulf %14, %19 : vector<8x256xf32>
    %21 = arith.addf %17, %20 : vector<8x256xf32>
    %c0_5 = arith.constant 0 : index
    %c0_6 = arith.constant 0 : index
    %22 = vector.load %arg5[%c0_5, %c0_6] : memref<8x256xf32, #tpu.memory_space<vmem>>, vector<8x256xf32>
    tpu.vector_store %arg5[%c0_5, %c0_6], %21 {strides = array<i32>} : memref<8x256xf32, #tpu.memory_space<vmem>>, vector<8x256xf32>,
    return
  }
  func.func @transform_0(%arg0: i32, %arg1: i32) -> (i32, i32) {
    %c0_i32 = arith.constant 0 : i32
    return %arg1, %arg0 : i32, i32
  }
  func.func @transform_1(%arg0: i32, %arg1: i32) -> (i32, i32) {
    %c0_i32 = arith.constant 0 : i32
    %c0_i32_0 = arith.constant 0 : i32
    return %c0_i32, %arg0 : i32, i32
  }
  func.func @transform_2(%arg0: i32, %arg1: i32) -> (i32, i32) {
    %c0_i32 = arith.constant 0 : i32
    %c0_i32_0 = arith.constant 0 : i32
    return %c0_i32, %arg0 : i32, i32
  }
  func.func @transform_3(%arg0: i32, %arg1: i32) -> (i32, i32) {
    %c0_i32 = arith.constant 0 : i32
    return %arg1, %arg0 : i32, i32
  }
}

</mosaic_0001>

<bundles_post_ra>
// kernel: tpu_custom_call.1
= control target key start
LH: loop header
LB: loop body
LE: loop exit
PB: predicated region body
PF: predicated region fallthrough
CT: control target
= control target key end

     0   :  { %8 = vsyncpa [#allocation3], 0  ;;  %s244_s0 = inlined_call_operand.hbm [shape: f32[8,256], index: 0, kind: input, shape index: {}]   ;;  %s245_s1 = inlined_call_operand.hbm [shape: f32[1,256], index: 1, kind: input, shape index: {}]   ;;  %s246_s2 = inlined_call_operand.vmem [shape: f32[1,256], index: 2, kind: input, shape index: {}]   ;;  %s247_s3 = inlined_call_operand.hbm [shape: f32[8,256], index: 3, kind: output, shape index: {}]  }
   0x1   :  { %9 = vsyncpa [#allocation6], 0 }
   0x2   :  { %10 = vsyncpa [#allocation4], 0  ;;  %s195_s12 = smov [#allocation2]   ;;  %s196_s14 = smov [#allocation5]  }
   0x3   :  { %s17_s13 = sshll.u32 %s195_s12, 4  ;;  %s27_s15 = sshll.u32 %s196_s14, 4  ;;  %s18_s13 = int_to_ptr.vmem [resolvable:$true] %s17_s13  ;;  %s28_s15 = int_to_ptr.vmem [resolvable:$true] %s27_s15 }
   0x4   :  { %s137_s16 = scalar_lea.vmem %s18_s13, 256  ;;  %p142_p1 = scmp.lt.s32.totalorder %s18_s13, %s18_s13 }
   0x5   :  { %p138_p0 = scmp.ne.s32.totalorder %s18_s13, %s137_s16  ;;  %p143_p2 = scmp.lt.s32.totalorder %s137_s16, %s137_s16 }
   0x7   :  { %p144_p3 = por %p143_p2, %p142_p1 }
   0x9   :  { %p145_p4 = pnand %p144_p3, %p138_p0 }
   0xb   :  { %148 = shalt.err (!%p145_p4)
}
   0xc   :  { %20 = dma.hbm_to_vmem [thread:$0]  %s244_s0, 256, %s18_s13, [#allocation3]  }
   0xd   :  { %s157_s19 = scalar_lea.vmem %s28_s15, 32  ;;  %p162_p6 = scmp.lt.s32.totalorder %s28_s15, %s28_s15 }
   0xe   :  { %p158_p5 = scmp.ne.s32.totalorder %s28_s15, %s157_s19  ;;  %p163_p7 = scmp.lt.s32.totalorder %s157_s19, %s157_s19 }
  0x10   :  { %p164_p8 = por %p163_p7, %p162_p6 }
  0x12   :  { %p165_p9 = pnand %p164_p8, %p158_p5 }
  0x14   :  { %168 = shalt.err (!%p165_p9)
}
  0x15   :  { %30 = dma.hbm_to_vmem [thread:$0]  %s245_s1, 32, %s28_s15, [#allocation6]  }
  0x16   :  { %189 = dma.done.wait [#allocation3], 256  }
  0x17   :  { %190 = vsyncadd [#allocation3], 4294967040 }
  0x18   :  { %191 = dma.done.wait [#allocation6], 32  }
  0x19   :  { %192 = vsyncadd [#allocation6], 4294967264  ;;  %v40_v0 = vld [vmem:[#allocation2 + $0x8] sm:$0xff]  ;;  %v39_v1 = vld [vmem:[#allocation2] sm:$0xff]  ;;  %s197_s22 = smov 1   ;;  %s198_s0 = smov 127   ;;  %v63_v2 = vlaneseq }
  0x1a   :  { %53 = vrot.lane.b32.xlu1 %v40_v0, %s197_s22  ;;  %43 = vrot.lane.b32.xlu0 %v39_v1, %s198_s0  ;;  %v76_v8 = vld [vmem:[#allocation5] sm:$0x3]  ;;  %v90_v15 = vld [vmem:[%s246_s2] sm:$0x3]  ;;  %vm58_vm0 = vcmask 7168   ;;  %vm47_vm1 = vcmask 1039360  }
  0x1b   :  { %v64_v3 = vand.u32 127, %v63_v2  ;;  %v79_v4 = vshrl.u32 %v63_v2, 7  ;;  %s199_s2 = smov [#allocation7]  }
  0x1c   :  { %s114_s24 = sshll.u32 %s199_s2, 4  ;;  %s115_s24 = int_to_ptr.vmem [resolvable:$true] %s114_s24 }
  0x1d   :  { %v65_v5 = vadd.s32 128, %v64_v3  ;;  %v84_v6 = vsub.s32 1, %v79_v4  ;;  %v80_v7 = vsub.s32 0, %v79_v4  ;;  %v66_v9 = vand.u32 1, %v64_v3  ;;  %s169_s25 = scalar_lea.vmem %s115_s24, 256  ;;  %p174_p11 = scmp.lt.s32.totalorder %s115_s24, %s115_s24 }
  0x1e   :  { %56 = vrot.lane.b32.xlu1 %v39_v1, %s197_s22  ;;  %45 = vrot.lane.b32.xlu0 %v40_v0, %s198_s0  ;;  %p170_p10 = scmp.ne.s32.totalorder %s115_s24, %s169_s25  ;;  %p175_p12 = scmp.lt.s32.totalorder %s169_s25, %s169_s25 }
  0x1f   :  { %v67_v10 = vand.u32 1, %v65_v5  ;;  %v85_v11 = vrot.slane %v76_v8, %v84_v6  ;;  %v81_v12 = vrot.slane %v76_v8, %v80_v7  ;;  %vm229_vm2 = vcmp.eq.s32.totalorder %v66_v9, 0 }
  0x20   :  { %v95_v18 = vrot.slane %v90_v15, %v80_v7  ;;  %v99_v19 = vrot.slane %v90_v15, %v84_v6  ;;  %p176_p13 = por %p175_p12, %p174_p11 }
  0x21   :  { %vm233_vm3 = vcmp.eq.s32.totalorder %v67_v10, 0  ;;  %v89_v20 = vmul.f32 %v85_v11, %v40_v0  ;;  %v88_v21 = vmul.f32 %v81_v12, %v39_v1 }
  0x22   :  { %p177_p0 = pnand %p176_p13, %p170_p10 }
  0x8c   :  { %v54_v13 = vpop.permute.xlu1 %53  ;;  %v44_v14 = vpop.permute.xlu0 %43 }
  0x90   :  { %v57_v22 = vpop.permute.xlu1 %56  ;;  %v46_v23 = vpop.permute.xlu0 %45 }
  0x91   :  { %v59_v24 = vsel %vm58_vm0, %v57_v22, %v54_v13  ;;  %v62_v25 = vsel %vm58_vm0, %v54_v13, %v57_v22  ;;  %v48_v26 = vsel %vm47_vm1, %v44_v14, %v46_v23  ;;  %v52_v27 = vsel %vm47_vm1, %v46_v23, %v44_v14 }
  0x92   :  { %v74_v28 = vsel %vm229_vm2, %v48_v26, %v62_v25  ;;  %v75_v29 = vsel %vm233_vm3, %v52_v27, %v59_v24 }
  0x93   :  { %v102_v30 = vmul.f32 %v95_v18, %v74_v28  ;;  %v103_v31 = vmul.f32 %v99_v19, %v75_v29 }
  0x95   :  { %v104_v32 = vadd.f32 %v102_v30, %v88_v21  ;;  %v105_v33 = vadd.f32 %v103_v31, %v89_v20 }
  0x97   :  { %106 = vst [vmem:[#allocation7] sm:$0xff] %v104_v32  ;;  %107 = vst [vmem:[#allocation7 + $0x8] sm:$0xff] %v105_v33 }
  0x98   :  { %180 = shalt.err (!%p177_p0)
}
  0x99   :  { %117 = dma.vmem_to_hbm [thread:$0]  %s115_s24, 256, %s247_s3, [#allocation4]  }
  0x9a   :  { %193 = dma.done.wait [#allocation4], 256  }
  0x9b   :  { %194 = vsyncadd [#allocation4], 4294967040 }
  0x9c   :  { %121 = vsyncpa [#allocation3], 1 }
  0x9d   :  { %122 = vsyncpa [#allocation6], 1 }
  0x9e   :  { %123 = vsyncpa [#allocation4], 1 }

</bundles_post_ra>
